<compile_context>
chip_gen: v6e
topology: v6e:2x2x1
jax: 0.10.0
libtpu: 0.0.40
codegen_flags: <defaults>
</compile_context>

<pallas_src>
import jax
import jax.numpy as jnp
from jax.experimental import pallas as pl
from jax.experimental.pallas import tpu as pltpu


# ---------------------------------------------------------------------------
# Pallas kernel: fused linear_start / linear_end heads + sigmoid
# ---------------------------------------------------------------------------
def uie_head_kernel(seq_ref, w_ref, b_ref, out_ref):
    # seq_ref: (tm, H) bf16/f32   w_ref: (2, H) bf16/f32
    # b_ref:   (2,) f32 in SMEM   out_ref: (2, tm) f32  (lane-dense)
    logits = jax.lax.dot_general(
        w_ref[...], seq_ref[...],
        dimension_numbers=(((1,), (1,)), ((), ())),     # contract over H
        preferred_element_type=jnp.float32,             # f32 accumulation on MXU
    )                                                   # -> (2, tm) f32
    # Bias adds are scalar reads from SMEM; sigmoid stays in f32 (EUP).
    out_ref[0:1, :] = jax.nn.sigmoid(logits[0:1, :] + b_ref[0])
    out_ref[1:2, :] = jax.nn.sigmoid(logits[1:2, :] + b_ref[1])


def _round_up(x, m):
    return ((x + m - 1) // m) * m


def uie_heads(sequence_output, w_start, b_start, w_end, b_end, *,
              tm=1024, compute_dtype=jnp.bfloat16):
    """sequence_output: (B, S, H) -> (start_prob (B, S), end_prob (B, S))."""
    B, S, H = sequence_output.shape
    M = B * S

    # Lane-dense row tile: multiple of 128, capped by the requested tm and by
    # (roughly) the problem size so tiny demos don't over-pad.
    tm_eff = max(128, min(_round_up(tm, 128), _round_up(M, 128)))
    M_pad = _round_up(M, tm_eff)

    # bf16 streaming halves HBM traffic for this memory-bound kernel.
    seq2d = sequence_output.reshape(M, H).astype(compute_dtype)
    if M_pad != M:
        seq2d = jnp.pad(seq2d, ((0, M_pad - M), (0, 0)))

    # Pack both heads into one (2, H) weight; biases as two SMEM scalars.
    w = jnp.stack([w_start, w_end], axis=0).astype(compute_dtype)      # (2, H)
    b = jnp.stack([jnp.asarray(b_start, jnp.float32),
                   jnp.asarray(b_end, jnp.float32)])                   # (2,)

    grid = (M_pad // tm_eff,)
    in_bytes = M_pad * H * seq2d.dtype.itemsize + 2 * H * w.dtype.itemsize
    out_bytes = 2 * M_pad * 4
    cost = pl.CostEstimate(
        flops=4 * M_pad * H,          # two (tm,H) GEMV-like heads per row
        transcendentals=2 * M_pad,    # sigmoid per row per head
        bytes_accessed=in_bytes + out_bytes,
    )

    probs = pl.pallas_call(
        uie_head_kernel,
        out_shape=jax.ShapeDtypeStruct((2, M_pad), jnp.float32),
        grid_spec=pltpu.PrefetchScalarGridSpec(
            num_scalar_prefetch=0,
            grid=grid,
            in_specs=[
                pl.BlockSpec((tm_eff, H), lambda i: (i, 0)),            # seq rows
                pl.BlockSpec((2, H), lambda i: (0, 0)),                 # packed W
                pl.BlockSpec(memory_space=pltpu.MemorySpace.SMEM),      # biases
            ],
            out_specs=pl.BlockSpec((2, tm_eff), lambda i: (0, i)),      # lane-dense
        ),
        compiler_params=pltpu.CompilerParams(
            dimension_semantics=("parallel",)),
        cost_estimate=cost,
    )(seq2d, w, b)

    start_prob = probs[0, :M].reshape(B, S)   # torch.squeeze(start_logits, -1)
    end_prob = probs[1, :M].reshape(B, S)
    return start_prob, end_prob


# ---------------------------------------------------------------------------
# Encoder stand-in (plain JAX glue).
# ---------------------------------------------------------------------------
# TODO(synk): the real UIE backbone is an arbitrary transformers.AutoModel
# (ernie3.0) passed into __init__; a full transformer encoder is out of scope
# here, so a deterministic embedding-sum stub produces `last_hidden_state`.
def stub_encoder(params, input_ids, token_type_ids, pos_ids=None):
    B, S = input_ids.shape
    if pos_ids is None:
        pos_ids = jnp.broadcast_to(jnp.arange(S, dtype=jnp.int32), (B, S))
    h = (params["word_emb"][input_ids]
         + params["type_emb"][token_type_ids]
         + params["pos_emb"][pos_ids])
    return h  # (B, S, H) — plays the role of encoder(...)['last_hidden_state']


# ---------------------------------------------------------------------------
# Full UIE forward
# ---------------------------------------------------------------------------
def uie_forward(params, input_ids, token_type_ids,
                attention_mask=None, pos_ids=None):
    sequence_output = stub_encoder(params, input_ids, token_type_ids, pos_ids)
    return uie_heads(sequence_output,
                     params["w_start"], params["b_start"],
                     params["w_end"], params["b_end"])


def init_params(key, vocab_size, type_vocab_size, max_seq, hidden_size):
    ks = jax.random.split(key, 5)
    scale = 0.02
    return {
        "word_emb": scale * jax.random.normal(ks[0], (vocab_size, hidden_size),
                                              jnp.float32),
        "type_emb": scale * jax.random.normal(ks[1], (type_vocab_size, hidden_size),
                                              jnp.float32),
        "pos_emb": scale * jax.random.normal(ks[2], (max_seq, hidden_size),
                                             jnp.float32),
        # nn.Linear(hidden_size, 1) weights/biases for start and end heads.
        "w_start": scale * jax.random.normal(ks[3], (hidden_size,), jnp.float32),
        "b_start": jnp.float32(0.0),
        "w_end": scale * jax.random.normal(ks[4], (hidden_size,), jnp.float32),
        "b_end": jnp.float32(0.0),
    }


if __name__ == "__main__":
    B, S, H = 2, 8, 32
    VOCAB, TYPES = 100, 2

    key = jax.random.PRNGKey(0)
    k_param, k_ids, k_types = jax.random.split(key, 3)

    params = init_params(k_param, VOCAB, TYPES, S, H)
    input_ids = jax.random.randint(k_ids, (B, S), 0, VOCAB, dtype=jnp.int32)
    token_type_ids = jax.random.randint(k_types, (B, S), 0, TYPES,
                                        dtype=jnp.int32)

    start_prob, end_prob = uie_forward(params, input_ids, token_type_ids)
    jax.block_until_ready((start_prob, end_prob))

    # Reference check against plain-JAX math using the same bf16-cast operands
    # the kernel streams (accumulation / sigmoid stay f32 in both paths).
    seq = stub_encoder(params, input_ids, token_type_ids)
    seq_c = seq.astype(jnp.bfloat16).astype(jnp.float32)
    w_s = params["w_start"].astype(jnp.bfloat16).astype(jnp.float32)
    w_e = params["w_end"].astype(jnp.bfloat16).astype(jnp.float32)
    ref_start = jax.nn.sigmoid(seq_c @ w_s + params["b_start"])
    ref_end = jax.nn.sigmoid(seq_c @ w_e + params["b_end"])

    assert start_prob.shape == (B, S) and end_prob.shape == (B, S)
    assert jnp.allclose(start_prob, ref_start, atol=1e-3)
    assert jnp.allclose(end_prob, ref_end, atol=1e-3)

    print("KERNEL_OK")
</pallas_src>

<mosaic_0001>
module attributes {stable_mosaic.version = 11 : i64} {
  func.func @uie_head_kernel(%arg0: i32, %arg1: memref<128x32xbf16, #tpu.memory_space<vmem>>, %arg2: memref<2x32xbf16, #tpu.memory_space<vmem>>, %arg3: memref<2xf32, #tpu.memory_space<smem>>, %arg4: memref<2x128xf32, #tpu.memory_space<vmem>>) attributes {dimension_semantics = [#tpu.dimension_semantics<parallel>], iteration_bounds = array<i64: 1>, scalar_prefetch = 0 : i64, scratch_operands = 0 : i64, tpu.core_type = #tpu.core_type<tc>, window_params = [{transform_indices = @transform_0, window_bounds = array<i64: 128, 32>}, {pipeline_mode = #tpu.pipeline_mode<synchronous>, transform_indices = @transform_1, window_bounds = array<i64: 2, 32>}, {transform_indices = @transform_2, window_bounds = array<i64: 2>}, {transform_indices = @transform_3, window_bounds = array<i64: 2, 128>}]} {
    %c0 = arith.constant 0 : index
    %c0_0 = arith.constant 0 : index
    %0 = vector.load %arg2[%c0, %c0_0] : memref<2x32xbf16, #tpu.memory_space<vmem>>, vector<2x32xbf16>
    %c0_1 = arith.constant 0 : index
    %c0_2 = arith.constant 0 : index
    %1 = vector.load %arg1[%c0_1, %c0_2] : memref<128x32xbf16, #tpu.memory_space<vmem>>, vector<128x32xbf16>
    %cst = arith.constant dense<0.000000e+00> : vector<2x128xf32>
    %2 = tpu.matmul %0, %1, %cst {dimension_numbers = #tpu.dot_dimension_numbers<[1], [1], [0], [0], [0, 0, 1, 0], [], []>} : vector<2x32xbf16>, vector<128x32xbf16>, vector<2x128xf32> -> vector<2x128xf32>
    %3 = vector.extract_strided_slice %2 {offsets = [0, 0], sizes = [1, 128], strides = [1, 1]} : vector<2x128xf32> to vector<1x128xf32>
    %c0_3 = arith.constant 0 : index
    %4 = memref.load %arg3[%c0_3] : memref<2xf32, #tpu.memory_space<smem>>
    %5 = vector.broadcast %4 : f32 to vector<1x128xf32>
    %6 = arith.addf %3, %5 : vector<1x128xf32>
    %7 = arith.negf %6 : vector<1x128xf32>
    %8 = math.exp %7 : vector<1x128xf32>
    %cst_4 = arith.constant 1.000000e+00 : f32
    %9 = vector.broadcast %cst_4 : f32 to vector<1x128xf32>
    %10 = arith.addf %9, %8 : vector<1x128xf32>
    %11 = arith.divf %9, %10 : vector<1x128xf32>
    %c0_5 = arith.constant 0 : index
    %c0_6 = arith.constant 0 : index
    %12 = vector.load %arg4[%c0_5, %c0_6] : memref<2x128xf32, #tpu.memory_space<vmem>>, vector<1x128xf32>
    tpu.vector_store %arg4[%c0_5, %c0_6], %11 {strides = array<i32>} : memref<2x128xf32, #tpu.memory_space<vmem>>, vector<1x128xf32>,
    %13 = vector.extract_strided_slice %2 {offsets = [1, 0], sizes = [1, 128], strides = [1, 1]} : vector<2x128xf32> to vector<1x128xf32>
    %c1 = arith.constant 1 : index
    %14 = memref.load %arg3[%c1] : memref<2xf32, #tpu.memory_space<smem>>
    %15 = vector.broadcast %14 : f32 to vector<1x128xf32>
    %16 = arith.addf %13, %15 : vector<1x128xf32>
    %17 = arith.negf %16 : vector<1x128xf32>
    %18 = math.exp %17 : vector<1x128xf32>
    %cst_7 = arith.constant 1.000000e+00 : f32
    %19 = vector.broadcast %cst_7 : f32 to vector<1x128xf32>
    %20 = arith.addf %19, %18 : vector<1x128xf32>
    %21 = arith.divf %19, %20 : vector<1x128xf32>
    %c1_8 = arith.constant 1 : index
    %c0_9 = arith.constant 0 : index
    %22 = vector.load %arg4[%c1_8, %c0_9] : memref<2x128xf32, #tpu.memory_space<vmem>>, vector<1x128xf32>
    tpu.vector_store %arg4[%c1_8, %c0_9], %21 {strides = array<i32>} : memref<2x128xf32, #tpu.memory_space<vmem>>, vector<1x128xf32>,
    return
  }
  func.func @transform_0(%arg0: i32) -> (i32, i32) {
    %c0_i32 = arith.constant 0 : i32
    %c0_i32_0 = arith.constant 0 : i32
    return %arg0, %c0_i32 : i32, i32
  }
  func.func @transform_1(%arg0: i32) -> (i32, i32) {
    %c0_i32 = arith.constant 0 : i32
    %c0_i32_0 = arith.constant 0 : i32
    %c0_i32_1 = arith.constant 0 : i32
    return %c0_i32, %c0_i32_0 : i32, i32
  }
  func.func @transform_2(%arg0: i32) -> i32 {
    %c0_i32 = arith.constant 0 : i32
    %c0_i32_0 = arith.constant 0 : i32
    return %c0_i32 : i32
  }
  func.func @transform_3(%arg0: i32) -> (i32, i32) {
    %c0_i32 = arith.constant 0 : i32
    %c0_i32_0 = arith.constant 0 : i32
    return %c0_i32, %arg0 : i32, i32
  }
}

</mosaic_0001>

<bundles_post_ra>
// kernel: tpu_custom_call.1
= control target key start
LH: loop header
LB: loop body
LE: loop exit
PB: predicated region body
PF: predicated region fallthrough
CT: control target
= control target key end

     0   :  { %8 = vsyncpa [#allocation4], 0  ;;  %s352_s0 = inlined_call_operand.vmem [shape: bf16[128,32], index: 0, kind: input, shape index: {}]   ;;  %s353_s1 = inlined_call_operand.vmem [shape: bf16[2,32], index: 1, kind: input, shape index: {}]   ;;  %s354_s2 = inlined_call_operand.vmem [shape: f32[2], index: 2, kind: input, shape index: {}]   ;;  %s355_s3 = inlined_call_operand.hbm [shape: f32[2,128], index: 3, kind: output, shape index: {}]  }
   0x1   :  { %9 = vsyncpa [#allocation3], 0  ;;  %s20_s14 = sshll.u32 %s354_s2, 4  ;;  %s21_s14 = int_to_ptr.vmem [resolvable:$true] %s20_s14 }
   0x2   :  { %s250_s15 = scalar_lea.vmem %s21_s14, 16  ;;  %p255_p1 = scmp.lt.s32.totalorder %s21_s14, %s21_s14 }
   0x3   :  { %p251_p0 = scmp.ne.s32.totalorder %s21_s14, %s250_s15  ;;  %p256_p2 = scmp.lt.s32.totalorder %s250_s15, %s250_s15 }
   0x5   :  { %p257_p3 = por %p256_p2, %p255_p1 }
   0x7   :  { %p258_p4 = pnand %p257_p3, %p251_p0 }
   0x9   :  { %261 = shalt.err (!%p258_p4)
}
   0xa   :  { %s286_s16 = smov [#allocation2]  }
   0xb   :  { %23 = dma.vmem_to_smem %s21_s14, 16, %s286_s16, [#allocation4]  }
   0xc   :  { %282 = dma.done.wait [#allocation4], 16  }
   0xd   :  { %283 = vsyncadd [#allocation4], 4294967280 }
   0xe   :  { %27 = sfence }
   0xf   :  { %v234_v0 = vld [vmem:[%s352_s0 + $0x38] sm:$0xff]   ;;  %v287_v1 = vmov 0.0   ;;  %vm86_vm0 = vcmask 261120   ;;  %v235_v3 = vld [vmem:[%s352_s0 + $0x30] sm:$0xff]   ;;  %vm288_vm1 = vmmov 0   ;;  %v236_v5 = vld [vmem:[%s352_s0 + $0x28] sm:$0xff]  }
  0x10   :  { %210 = vmatprep.subr.bf16.mxu0 %v287_v1  ;;  %v112_v2 = vsel %vm86_vm0, %v234_v0, 0  ;;  %v109_v4 = vsel %vm86_vm0, %v235_v3, 0  ;;  %226 = vmatprep.mubr.msk.bf16.mxu0 %vm288_vm1, %v287_v1  ;;  %v106_v6 = vsel %vm86_vm0, %v236_v5, 0  ;;  %v237_v7 = vld [vmem:[%s352_s0 + $0x20] sm:$0xff]   ;;  %v238_v9 = vld [vmem:[%s352_s0 + $0x18] sm:$0xff]   ;;  %v239_v11 = vld [vmem:[%s352_s0 + $0x10] sm:$0xff]  }
  0x11   :  { %211 = vmatpush3.bf16.xpose.msra.mxu0 %v112_v2  ;;  %v103_v8 = vsel %vm86_vm0, %v237_v7, 0  ;;  %v100_v10 = vsel %vm86_vm0, %v238_v9, 0  ;;  %v97_v12 = vsel %vm86_vm0, %v239_v11, 0  ;;  %v240_v13 = vld [vmem:[%s352_s0 + $0x8] sm:$0xff]   ;;  %v241_v15 = vld [vmem:[%s352_s0] sm:$0xff]   ;;  %s154_s7 = sld [smem:[#allocation2]] }
  0x12   :  { %212 = vmatprep.subr.bf16.mxu0 %v287_v1  ;;  %v94_v14 = vsel %vm86_vm0, %v240_v13, 0  ;;  %v91_v16 = vsel %vm86_vm0, %v241_v15, 0  ;;  %v29_v17 = vld [vmem:[%s353_s1] sm:$0x1]  ;;  %s199_s8 = sld [smem:[#allocation2 + $0x1]]  ;;  %s289_s0 = smov [#allocation5]  }
  0x13   :  { %s180_s1 = sshll.u32 %s289_s0, 4  ;;  %s181_s1 = int_to_ptr.vmem [resolvable:$true] %s180_s1 }
  0x14   :  { %s262_s9 = scalar_lea.vmem %s181_s1, 32  ;;  %p267_p6 = scmp.lt.s32.totalorder %s181_s1, %s181_s1 }
  0x15   :  { %p263_p5 = scmp.ne.s32.totalorder %s181_s1, %s262_s9  ;;  %p268_p7 = scmp.lt.s32.totalorder %s262_s9, %s262_s9 }
  0x17   :  { %v155_v18 = vstv %s154_s7  ;;  %p269_p8 = por %p268_p7, %p267_p6 }
  0x18   :  { %v165_v19 = vstv %s199_s8 }
  0x19   :  { %213 = vmatpush3.bf16.xpose.msra.mxu0 %v109_v4  ;;  %p270_p9 = pnand %p269_p8, %p263_p5 }
  0x1a   :  { %214 = vmatprep.subr.bf16.mxu0 %v287_v1 }
  0x21   :  { %215 = vmatpush3.bf16.xpose.msra.mxu0 %v106_v6 }
  0x22   :  { %216 = vmatprep.subr.bf16.mxu0 %v287_v1 }
  0x29   :  { %217 = vmatpush3.bf16.xpose.msra.mxu0 %v103_v8 }
  0x2a   :  { %218 = vmatprep.subr.bf16.mxu0 %v287_v1 }
  0x31   :  { %219 = vmatpush3.bf16.xpose.msra.mxu0 %v100_v10 }
  0x32   :  { %220 = vmatprep.subr.bf16.mxu0 %v287_v1 }
  0x39   :  { %221 = vmatpush3.bf16.xpose.msra.mxu0 %v97_v12 }
  0x3a   :  { %222 = vmatprep.subr.bf16.mxu0 %v287_v1 }
  0x41   :  { %223 = vmatpush3.bf16.xpose.msra.mxu0 %v94_v14 }
  0x42   :  { %224 = vmatprep.subr.bf16.mxu0 %v287_v1 }
  0x49   :  { %225 = vmatpush3.bf16.xpose.msra.mxu0 %v91_v16 }
  0x50   :  { %227 = vmatmul.mubr.msk.bf16.vlgmr.msra.gmra.mxu0 %vm86_vm0, %v29_v17 }
 0x110   :  { %v148_v20 = vpop.f32.mrf.mxu0 }
 0x111   :  { %v156_v21 = vadd.f32 %v155_v18, %v148_v20  ;;  %v166_v22 = vadd.f32 %v165_v19, %v148_v20 }
 0x112   :  { %v228_v23 = vpop.f32.mrf.mxu0 }
 0x113   :  { %v198_v24 = vmul.f32 -1.442695, %v156_v21  ;;  %v200_v25 = vmul.f32 -1.442695, %v166_v22 }
 0x114   :  { %v151_v26 = vpop.f32.mrf.mxu0 }
 0x115   :  { %242 = vpow2.f32 %v198_v24 }
 0x116   :  { %244 = vpow2.f32 %v200_v25  ;;  %v229_v27 = vpop.f32.mrf.mxu0 }
 0x122   :  { %v243_v28 = vpop.eup %242 }
 0x123   :  { %v245_v29 = vpop.eup %244  ;;  %v160_v30 = vadd.f32 1.0, %v243_v28 }
 0x124   :  { %v170_v31 = vadd.f32 1.0, %v245_v29 }
 0x125   :  { %246 = vrcp.f32 %v160_v30 }
 0x126   :  { %248 = vrcp.f32 %v170_v31 }
 0x132   :  { %v247_v32 = vpop.eup %246 }
 0x133   :  { %v249_v33 = vpop.eup %248  ;;  %163 = vst [vmem:[#allocation5] sm:$0x1] %v247_v32 }
 0x134   :  { %173 = vst [vmem:[#allocation5] sm:$0x2] %v249_v33 }
 0x135   :  { %273 = shalt.err (!%p270_p9)
}
 0x136   :  { %183 = dma.vmem_to_hbm [thread:$0]  %s181_s1, 32, %s355_s3, [#allocation3]  }
 0x137   :  { %284 = dma.done.wait [#allocation3], 32  }
 0x138   :  { %285 = vsyncadd [#allocation3], 4294967264 }
 0x139   :  { %187 = vsyncpa [#allocation3], 1 }
 0x13a   :  { %188 = vsyncpa [#allocation4], 1 }

</bundles_post_ra>
